<compile_context>
chip_gen: v6e
topology: v6e:2x2x1
jax: 0.10.0
libtpu: 0.0.40
codegen_flags: <defaults>
</compile_context>

<pallas_src>
import functools

import jax
import jax.numpy as jnp
from jax.experimental import pallas as pl
from jax.experimental.pallas import tpu as pltpu
import numpy as np

_LANES = 128


def _round_up(x, m):
    return (x + m - 1) // m * m


def _cdiv(a, b):
    return (a + b - 1) // b


def _vmem_capacity_bytes(default=64 * 1024 * 1024):
    """Physical VMEM per TensorCore; conservative 64 MiB fallback (v7x-safe)."""
    try:
        info = pltpu.get_tpu_info()
        for attr in ("vmem_capacity_bytes", "vmem_bytes", "vmem_size_bytes"):
            v = getattr(info, attr, None)
            if v:
                return int(v)
    except Exception:
        pass
    return default


def _pick_tile_n(n, c, in_itemsize, vmem_budget_bytes, *, max_tile=1 << 17,
                 min_grid=4, target_step_bytes=2 << 20):
    """Largest 128-multiple batch tile fitting the VMEM budget, capped so that
    (a) per-step blocks stay in the multi-MiB range (amortize ~0.35us/step) and
    (b) the grid keeps >= min_grid steps when the batch is large enough
        (DMA pipeline overlap + v7x dual-TensorCore 'parallel' sharding)."""
    m_bytes = c * c * 4
    # Per batch element: double-buffered logits block + target + out, plus ~4 live
    # f32 (C,)-sized temporaries in the body (x, p, onehot/m_rows, product).
    per_elem = 2 * c * in_itemsize + 2 * 4 + 2 * 4 + 4 * c * 4
    avail = max(vmem_budget_bytes - m_bytes, per_elem * 128)
    tile = (avail // per_elem) // 128 * 128
    tile = max(128, min(int(tile), max_tile))
    # Keep several grid steps, but never shrink a step below ~target_step_bytes of
    # HBM traffic (per-grid-step overhead amortization).
    hbm_per_elem = c * in_itemsize + 4
    step_floor = min(max_tile, _round_up(max(128, target_step_bytes // hbm_per_elem), 128))
    grid_cap = max(step_floor, _round_up(_cdiv(n, min_grid), 128))
    tile = min(tile, grid_cap)
    tile = min(tile, _round_up(n, 128))
    return int(max(tile, 128))


# --------------------------------------------------------------------------- #
# Kernels
# --------------------------------------------------------------------------- #
def _loss_kernel_cn(logits_ref, target_ref, mt_ref, out_ref, *, total_n, n_classes,
                    normalization, use_mxu, mxu_bf16, reduce_in_kernel, ragged):
    """Class-major layout (small/medium C): logits_ref (C, TN), target_ref (1, TN),
    mt_ref (C, C) = M^T.  out_ref is a (1, 128) per-tile partial-sum tile when
    reduce_in_kernel, else (1, TN) per-row losses (lane-dense store)."""
    i = pl.program_id(0)
    tn = logits_ref.shape[1]

    x = logits_ref[...].astype(jnp.float32)                        # (C, TN)
    if normalization == "softmax":
        x = x - jnp.max(x, axis=0, keepdims=True)                  # sublane reduce over C
        p = jnp.exp(x)                                             # EUP
        inv_denom = pl.reciprocal(jnp.sum(p, axis=0, keepdims=True), approx=True)
    elif normalization == "sigmoid":
        p = jax.nn.sigmoid(x)
        inv_denom = None
    else:  # identity
        p = x
        inv_denom = None

    tgt = target_ref[...]                                          # (1, TN) int32

    # m_rows[c, n] = M[target_n, c] = M^T[c, target_n]
    if use_mxu:
        mm_dtype = jnp.bfloat16 if mxu_bf16 else jnp.float32
        cls = jax.lax.broadcasted_iota(jnp.int32, (n_classes, 1), 0)
        onehot = (cls == tgt).astype(mm_dtype)                     # (C, TN), exact in bf16
        m_rows = jnp.dot(mt_ref[...].astype(mm_dtype), onehot,
                         preferred_element_type=jnp.float32)       # (C, TN)
    else:
        # Small C: a handful of VPU compare/selects instead of an MXU matmul.
        mt = mt_ref[...].astype(jnp.float32)
        m_rows = jnp.zeros((n_classes, tn), jnp.float32)
        for k in range(n_classes):
            m_rows = m_rows + jnp.where(tgt == k, mt[:, k:k + 1], 0.0)

    per_row = jnp.sum(m_rows * p, axis=0, keepdims=True)           # (1, TN)
    if inv_denom is not None:
        per_row = per_row * inv_denom                              # deferred softmax norm

    if reduce_in_kernel:
        def store_partial(vals):
            lane = jax.lax.broadcasted_iota(jnp.int32, (1, _LANES), 1)
            out_ref[...] = jnp.where(lane == 0, jnp.sum(vals), 0.0)

        if not ragged:
            store_partial(per_row)
        else:
            last = pl.num_programs(0) - 1

            @pl.when(i != last)
            def _():
                store_partial(per_row)

            @pl.when(i == last)
            def _():
                # Mask garbage lanes of the ragged block BEFORE reducing across
                # columns (jnp.where select -> no NaN leakage).
                col = jax.lax.broadcasted_iota(jnp.int32, (1, tn), 1)
                valid = (i * tn + col) < total_n
                store_partial(jnp.where(valid, per_row, 0.0))
    else:
        # Per-row losses: OOB lanes of the ragged last block are dropped by Pallas'
        # masked writeback, so no explicit mask is needed.
        out_ref[...] = per_row


def _loss_kernel_nc(logits_ref, target_ref, m_ref, out_ref, *, total_n, n_classes,
                    normalization, mxu_bf16, reduce_in_kernel, ragged):
    """Natural layout (C >= 128, classes already lane-dense): logits_ref (TN, C),
    target_ref (TN, 1), m_ref (C, C) = M."""
    i = pl.program_id(0)
    tn = logits_ref.shape[0]

    x = logits_ref[...].astype(jnp.float32)                        # (TN, C)
    if normalization == "softmax":
        x = x - jnp.max(x, axis=-1, keepdims=True)                 # lane reduce over C
        p = jnp.exp(x)
        inv_denom = pl.reciprocal(jnp.sum(p, axis=-1, keepdims=True), approx=True)
    elif normalization == "sigmoid":
        p = jax.nn.sigmoid(x)
        inv_denom = None
    else:
        p = x
        inv_denom = None

    tgt = target_ref[...]                                          # (TN, 1) int32
    mm_dtype = jnp.bfloat16 if mxu_bf16 else jnp.float32
    cls = jax.lax.broadcasted_iota(jnp.int32, (1, n_classes), 1)
    onehot = (cls == tgt).astype(mm_dtype)                         # (TN, C)
    m_rows = jnp.dot(onehot, m_ref[...].astype(mm_dtype),
                     preferred_element_type=jnp.float32)           # (TN, C) = M[target, :]

    per_row = jnp.sum(m_rows * p, axis=-1, keepdims=True)          # (TN, 1)
    if inv_denom is not None:
        per_row = per_row * inv_denom

    if reduce_in_kernel:
        def store_partial(vals):
            lane = jax.lax.broadcasted_iota(jnp.int32, (1, _LANES), 1)
            out_ref[...] = jnp.where(lane == 0, jnp.sum(vals), 0.0)

        if not ragged:
            store_partial(per_row)
        else:
            last = pl.num_programs(0) - 1

            @pl.when(i != last)
            def _():
                store_partial(per_row)

            @pl.when(i == last)
            def _():
                row = jax.lax.broadcasted_iota(jnp.int32, (tn, 1), 0)
                valid = (i * tn + row) < total_n
                store_partial(jnp.where(valid, per_row, 0.0))
    else:
        out_ref[...] = per_row


# --------------------------------------------------------------------------- #
# Wrapper
# --------------------------------------------------------------------------- #
def cost_sensitive_loss_pallas(logits, target, M, *, normalization="softmax",
                               reduction="mean", tile_n=None, mxu_bf16=True,
                               logits_are_class_major=False):
    """logits: (N, C) float (f32 or bf16) -- or (C, N) if logits_are_class_major,
    target: (N,) int, M: (C, C) float -> loss (scalar or per-row)."""
    if logits_are_class_major:
        c, n = logits.shape
    else:
        n, c = logits.shape
    if target.shape[0] != n:
        raise ValueError(
            "Expected input batch_size ({}) to match target batch_size ({}).".format(
                n, target.shape[0]))
    if reduction not in ("none", "mean", "sum"):
        raise ValueError("`reduction` must be one of 'none', 'mean', or 'sum'.")

    reduce_in_kernel = reduction in ("mean", "sum")
    in_itemsize = jnp.dtype(logits.dtype).itemsize

    cap = _vmem_capacity_bytes()
    if tile_n is None:
        tile_n = _pick_tile_n(n, c, in_itemsize, cap // 2)
    tile_n = max(128, _round_up(int(tile_n), 128))
    grid_len = _cdiv(n, tile_n)
    ragged = (n % tile_n) != 0

    # Layout choice: natural (N, C) when classes already fill the lane axis,
    # otherwise a single class-major (C, N) transpose (see module docstring).
    use_natural = (not logits_are_class_major) and c >= 128
    uses_mxu = use_natural or (c > 16)

    m_bytes = c * c * 4
    block_in = tile_n * c * in_itemsize
    required = m_bytes + 2 * block_in + 4 * tile_n * c * 4 + 8 * tile_n + (2 << 20)
    vmem_limit = int(min(max(required, 32 << 20), cap * 3 // 4))

    # Invariant cost matrix: no point double-buffering it.
    m_spec_kwargs = {}
    if hasattr(pl, "Buffered"):
        m_spec_kwargs["pipeline_mode"] = pl.Buffered(1)

    if use_natural:
        kern = functools.partial(
            _loss_kernel_nc, total_n=n, n_classes=c, normalization=normalization,
            mxu_bf16=mxu_bf16, reduce_in_kernel=reduce_in_kernel, ragged=ragged)
        logits_in = logits                                         # no wrapper copy
        target_in = target.astype(jnp.int32).reshape(n, 1)
        m_in = M.astype(jnp.float32)
        in_specs = [
            pl.BlockSpec((tile_n, c), lambda i: (i, 0)),
            pl.BlockSpec((tile_n, 1), lambda i: (i, 0)),
            pl.BlockSpec((c, c), lambda i: (0, 0), **m_spec_kwargs),
        ]
        if reduce_in_kernel:
            out_shape = jax.ShapeDtypeStruct((1, grid_len * _LANES), jnp.float32)
            out_spec = pl.BlockSpec((1, _LANES), lambda i: (0, i))
        else:
            out_shape = jax.ShapeDtypeStruct((n, 1), jnp.float32)
            out_spec = pl.BlockSpec((tile_n, 1), lambda i: (i, 0))
    else:
        kern = functools.partial(
            _loss_kernel_cn, total_n=n, n_classes=c, normalization=normalization,
            use_mxu=uses_mxu, mxu_bf16=mxu_bf16,
            reduce_in_kernel=reduce_in_kernel, ragged=ragged)
        logits_in = logits if logits_are_class_major else jnp.transpose(logits)
        target_in = target.astype(jnp.int32).reshape(1, n)
        m_in = jnp.transpose(M).astype(jnp.float32)
        in_specs = [
            pl.BlockSpec((c, tile_n), lambda i: (0, i)),
            pl.BlockSpec((1, tile_n), lambda i: (0, i)),
            pl.BlockSpec((c, c), lambda i: (0, 0), **m_spec_kwargs),
        ]
        if reduce_in_kernel:
            out_shape = jax.ShapeDtypeStruct((1, grid_len * _LANES), jnp.float32)
            out_spec = pl.BlockSpec((1, _LANES), lambda i: (0, i))
        else:
            out_shape = jax.ShapeDtypeStruct((1, n), jnp.float32)
            out_spec = pl.BlockSpec((1, tile_n), lambda i: (0, i))

    flops = n * (6 * c + 4) + (2 * n * c * c if uses_mxu else 4 * n * c)
    out_bytes = grid_len * _LANES * 4 if reduce_in_kernel else 4 * n
    cost = pl.CostEstimate(
        flops=int(flops),
        transcendentals=int(n * c + n),
        bytes_accessed=int(n * c * in_itemsize + n * 4 + m_bytes + out_bytes))

    out = pl.pallas_call(
        kern,
        out_shape=out_shape,
        grid_spec=pltpu.PrefetchScalarGridSpec(
            num_scalar_prefetch=0,
            grid=(grid_len,),
            in_specs=in_specs,
            out_specs=out_spec),
        compiler_params=pltpu.CompilerParams(
            dimension_semantics=("parallel",),
            vmem_limit_bytes=vmem_limit),
        cost_estimate=cost,
    )(logits_in, target_in, m_in)

    if reduction == "none":
        return out[:, 0] if use_natural else out[0, :]
    total = jnp.sum(out)          # unused lanes hold zeros
    if reduction == "mean":
        return total / jnp.float32(n)
    return total


def make_cost_matrix(n_classes, exp=1):
    x = np.abs(np.arange(n_classes, dtype=np.float32))
    M = np.abs(x[:, np.newaxis] - x[np.newaxis, :]) ** exp
    M /= M.max()
    return jnp.asarray(M, dtype=jnp.float32)


if __name__ == "__main__":
    key = jax.random.PRNGKey(0)

    def reference(logits, target, M, normalization="softmax", reduction="mean"):
        if normalization == "softmax":
            preds = jax.nn.softmax(logits, axis=1)
        elif normalization == "sigmoid":
            preds = jax.nn.sigmoid(logits)
        else:
            preds = logits
        loss = jnp.sum(M[target, :] * preds.astype(jnp.float32), axis=-1)
        if reduction == "none":
            return loss
        return jnp.mean(loss) if reduction == "mean" else jnp.sum(loss)

    k1, k2, k3, k4 = jax.random.split(key, 4)

    # --- primary demo: small C (class-major / VPU-select path), reduction='mean' ---
    n_classes, batch = 4, 16
    logits = jax.random.normal(k1, (batch, n_classes), dtype=jnp.float32)
    target = jax.random.randint(k2, (batch,), 0, n_classes, dtype=jnp.int32)
    M = make_cost_matrix(n_classes, exp=1)

    out = jax.block_until_ready(cost_sensitive_loss_pallas(logits, target, M))
    ref = reference(logits, target, M)
    assert jnp.allclose(out, ref, rtol=5e-3, atol=1e-4), (out, ref)

    # per-row losses on the same inputs (reduction='none')
    out_none = jax.block_until_ready(
        cost_sensitive_loss_pallas(logits, target, M, reduction="none"))
    ref_none = reference(logits, target, M, reduction="none")
    assert jnp.allclose(out_none, ref_none, rtol=5e-3, atol=1e-4), (out_none, ref_none)

    # --- natural-layout path: C >= 128 (one-hot @ M in bf16 on the MXU, no relayout) ---
    n_classes2, batch2 = 128, 48
    logits2 = jax.random.normal(k3, (batch2, n_classes2), dtype=jnp.float32)
    target2 = jax.random.randint(k4, (batch2,), 0, n_classes2, dtype=jnp.int32)
    M2 = make_cost_matrix(n_classes2, exp=1)
    out2 = jax.block_until_ready(cost_sensitive_loss_pallas(logits2, target2, M2))
    ref2 = reference(logits2, target2, M2)
    assert jnp.allclose(out2, ref2, rtol=1e-2, atol=1e-4), (out2, ref2)

    print("KERNEL_OK")
</pallas_src>

<mosaic_0001>
module attributes {stable_mosaic.version = 11 : i64} {
  func.func @_loss_kernel_cn(%arg0: i32, %arg1: memref<4x128xf32, #tpu.memory_space<vmem>>, %arg2: memref<1x128xi32, #tpu.memory_space<vmem>>, %arg3: memref<4x4xf32, #tpu.memory_space<vmem>>, %arg4: memref<1x128xf32, #tpu.memory_space<vmem>>) attributes {dimension_semantics = [#tpu.dimension_semantics<parallel>], iteration_bounds = array<i64: 1>, scalar_prefetch = 0 : i64, scratch_operands = 0 : i64, tpu.core_type = #tpu.core_type<tc>, window_params = [{transform_indices = @transform_0, window_bounds = array<i64: 4, 128>}, {transform_indices = @transform_1, window_bounds = array<i64: 1, 128>}, {pipeline_mode = #tpu.pipeline_mode<synchronous>, transform_indices = @transform_2, window_bounds = array<i64: 4, 4>}, {transform_indices = @transform_3, window_bounds = array<i64: 1, 128>}]} {
    %c0 = arith.constant 0 : index
    %c0_0 = arith.constant 0 : index
    %0 = vector.load %arg1[%c0, %c0_0] : memref<4x128xf32, #tpu.memory_space<vmem>>, vector<4x128xf32>
    %cst = arith.constant dense<0xFF800000> : vector<128xf32>
    %1 = vector.multi_reduction <maximumf>, %0, %cst [0] : vector<4x128xf32> to vector<128xf32>
    %2 = vector.shape_cast %1 : vector<128xf32> to vector<1x128xf32>
    %3 = vector.broadcast %2 : vector<1x128xf32> to vector<4x128xf32>
    %4 = arith.subf %0, %3 : vector<4x128xf32>
    %5 = math.exp %4 : vector<4x128xf32>
    %cst_1 = arith.constant dense<0.000000e+00> : vector<128xf32>
    %6 = vector.multi_reduction <add>, %5, %cst_1 [0] : vector<4x128xf32> to vector<128xf32>
    %7 = vector.shape_cast %6 : vector<128xf32> to vector<1x128xf32>
    %8 = tpu.reciprocal %7 {approx = true} : vector<1x128xf32> -> vector<1x128xf32>
    %c0_2 = arith.constant 0 : index
    %c0_3 = arith.constant 0 : index
    %9 = vector.load %arg2[%c0_2, %c0_3] : memref<1x128xi32, #tpu.memory_space<vmem>>, vector<1x128xi32>
    %c0_4 = arith.constant 0 : index
    %c0_5 = arith.constant 0 : index
    %10 = vector.load %arg3[%c0_4, %c0_5] : memref<4x4xf32, #tpu.memory_space<vmem>>, vector<4x4xf32>
    %cst_6 = arith.constant 0.000000e+00 : f32
    %11 = vector.broadcast %cst_6 : f32 to vector<4x128xf32>
    %c0_i32 = arith.constant 0 : i32
    %12 = vector.broadcast %c0_i32 : i32 to vector<1x128xi32>
    %13 = arith.cmpi eq, %9, %12 : vector<1x128xi32>
    %14 = vector.extract_strided_slice %10 {offsets = [0, 0], sizes = [4, 1], strides = [1, 1]} : vector<4x4xf32> to vector<4x1xf32>
    %cst_7 = arith.constant 0.000000e+00 : f32
    %15 = vector.shape_cast %13 : vector<1x128xi1> to vector<1x128xi1>
    %16 = vector.broadcast %15 : vector<1x128xi1> to vector<4x128xi1>
    %17 = vector.shape_cast %14 : vector<4x1xf32> to vector<4x1xf32>
    %18 = vector.broadcast %17 : vector<4x1xf32> to vector<4x128xf32>
    %19 = vector.broadcast %cst_7 : f32 to vector<4x128xf32>
    %20 = arith.select %16, %18, %19 : vector<4x128xi1>, vector<4x128xf32>
    %21 = arith.addf %11, %20 : vector<4x128xf32>
    %c1_i32 = arith.constant 1 : i32
    %22 = vector.broadcast %c1_i32 : i32 to vector<1x128xi32>
    %23 = arith.cmpi eq, %9, %22 : vector<1x128xi32>
    %24 = vector.extract_strided_slice %10 {offsets = [0, 1], sizes = [4, 1], strides = [1, 1]} : vector<4x4xf32> to vector<4x1xf32>
    %cst_8 = arith.constant 0.000000e+00 : f32
    %25 = vector.shape_cast %23 : vector<1x128xi1> to vector<1x128xi1>
    %26 = vector.broadcast %25 : vector<1x128xi1> to vector<4x128xi1>
    %27 = vector.shape_cast %24 : vector<4x1xf32> to vector<4x1xf32>
    %28 = vector.broadcast %27 : vector<4x1xf32> to vector<4x128xf32>
    %29 = vector.broadcast %cst_8 : f32 to vector<4x128xf32>
    %30 = arith.select %26, %28, %29 : vector<4x128xi1>, vector<4x128xf32>
    %31 = arith.addf %21, %30 : vector<4x128xf32>
    %c2_i32 = arith.constant 2 : i32
    %32 = vector.broadcast %c2_i32 : i32 to vector<1x128xi32>
    %33 = arith.cmpi eq, %9, %32 : vector<1x128xi32>
    %34 = vector.extract_strided_slice %10 {offsets = [0, 2], sizes = [4, 1], strides = [1, 1]} : vector<4x4xf32> to vector<4x1xf32>
    %cst_9 = arith.constant 0.000000e+00 : f32
    %35 = vector.shape_cast %33 : vector<1x128xi1> to vector<1x128xi1>
    %36 = vector.broadcast %35 : vector<1x128xi1> to vector<4x128xi1>
    %37 = vector.shape_cast %34 : vector<4x1xf32> to vector<4x1xf32>
    %38 = vector.broadcast %37 : vector<4x1xf32> to vector<4x128xf32>
    %39 = vector.broadcast %cst_9 : f32 to vector<4x128xf32>
    %40 = arith.select %36, %38, %39 : vector<4x128xi1>, vector<4x128xf32>
    %41 = arith.addf %31, %40 : vector<4x128xf32>
    %c3_i32 = arith.constant 3 : i32
    %42 = vector.broadcast %c3_i32 : i32 to vector<1x128xi32>
    %43 = arith.cmpi eq, %9, %42 : vector<1x128xi32>
    %44 = vector.extract_strided_slice %10 {offsets = [0, 3], sizes = [4, 1], strides = [1, 1]} : vector<4x4xf32> to vector<4x1xf32>
    %cst_10 = arith.constant 0.000000e+00 : f32
    %45 = vector.shape_cast %43 : vector<1x128xi1> to vector<1x128xi1>
    %46 = vector.broadcast %45 : vector<1x128xi1> to vector<4x128xi1>
    %47 = vector.shape_cast %44 : vector<4x1xf32> to vector<4x1xf32>
    %48 = vector.broadcast %47 : vector<4x1xf32> to vector<4x128xf32>
    %49 = vector.broadcast %cst_10 : f32 to vector<4x128xf32>
    %50 = arith.select %46, %48, %49 : vector<4x128xi1>, vector<4x128xf32>
    %51 = arith.addf %41, %50 : vector<4x128xf32>
    %52 = arith.mulf %51, %5 : vector<4x128xf32>
    %cst_11 = arith.constant dense<0.000000e+00> : vector<128xf32>
    %53 = vector.multi_reduction <add>, %52, %cst_11 [0] : vector<4x128xf32> to vector<128xf32>
    %54 = vector.shape_cast %53 : vector<128xf32> to vector<1x128xf32>
    %55 = arith.mulf %54, %8 : vector<1x128xf32>
    %c0_i32_12 = arith.constant 0 : i32
    %56 = arith.cmpi ne, %arg0, %c0_i32_12 : i32
    %57 = arith.extui %56 : i1 to i32
    %c0_i32_13 = arith.constant 0 : i32
    %58 = arith.cmpi ne, %57, %c0_i32_13 : i32
    scf.if %58 {
      %62 = tpu.iota {dimensions = array<i32: 1>} : vector<1x128xi32>
      %c0_i32_16 = arith.constant 0 : i32
      %63 = vector.broadcast %c0_i32_16 : i32 to vector<1x128xi32>
      %64 = arith.cmpi eq, %62, %63 : vector<1x128xi32>
      %65 = vector.shape_cast %55 : vector<1x128xf32> to vector<1x1x128xf32>
      %cst_17 = arith.constant dense<0.000000e+00> : vector<1xf32>
      %66 = vector.multi_reduction <add>, %65, %cst_17 [1, 2] : vector<1x1x128xf32> to vector<1xf32>
      %67 = vector.shape_cast %66 : vector<1xf32> to vector<1x1x1xf32>
      %68 = vector.extract %67[0, 0, 0] : f32 from vector<1x1x1xf32>
      %cst_18 = arith.constant 0.000000e+00 : f32
      %69 = vector.broadcast %68 : f32 to vector<1x128xf32>
      %70 = vector.broadcast %cst_18 : f32 to vector<1x128xf32>
      %71 = arith.select %64, %69, %70 : vector<1x128xi1>, vector<1x128xf32>
      %c0_19 = arith.constant 0 : index
      %c0_20 = arith.constant 0 : index
      %72 = vector.load %arg4[%c0_19, %c0_20] : memref<1x128xf32, #tpu.memory_space<vmem>>, vector<1x128xf32>
      tpu.vector_store %arg4[%c0_19, %c0_20], %71 {strides = array<i32>} : memref<1x128xf32, #tpu.memory_space<vmem>>, vector<1x128xf32>,
    } else {
    }
    %c0_i32_14 = arith.constant 0 : i32
    %59 = arith.cmpi eq, %arg0, %c0_i32_14 : i32
    %60 = arith.extui %59 : i1 to i32
    %c0_i32_15 = arith.constant 0 : i32
    %61 = arith.cmpi ne, %60, %c0_i32_15 : i32
    scf.if %61 {
      %62 = tpu.iota {dimensions = array<i32: 1>} : vector<1x128xi32>
      %c128_i32 = arith.constant 128 : i32
      %63 = arith.muli %arg0, %c128_i32 : i32
      %64 = vector.broadcast %63 : i32 to vector<1x128xi32>
      %65 = arith.addi %64, %62 : vector<1x128xi32>
      %c16_i32 = arith.constant 16 : i32
      %66 = vector.broadcast %c16_i32 : i32 to vector<1x128xi32>
      %67 = arith.cmpi slt, %65, %66 : vector<1x128xi32>
      %cst_16 = arith.constant 0.000000e+00 : f32
      %68 = vector.broadcast %cst_16 : f32 to vector<1x128xf32>
      %69 = arith.select %67, %55, %68 : vector<1x128xi1>, vector<1x128xf32>
      %70 = tpu.iota {dimensions = array<i32: 1>} : vector<1x128xi32>
      %c0_i32_17 = arith.constant 0 : i32
      %71 = vector.broadcast %c0_i32_17 : i32 to vector<1x128xi32>
      %72 = arith.cmpi eq, %70, %71 : vector<1x128xi32>
      %73 = vector.shape_cast %69 : vector<1x128xf32> to vector<1x1x128xf32>
      %cst_18 = arith.constant dense<0.000000e+00> : vector<1xf32>
      %74 = vector.multi_reduction <add>, %73, %cst_18 [1, 2] : vector<1x1x128xf32> to vector<1xf32>
      %75 = vector.shape_cast %74 : vector<1xf32> to vector<1x1x1xf32>
      %76 = vector.extract %75[0, 0, 0] : f32 from vector<1x1x1xf32>
      %cst_19 = arith.constant 0.000000e+00 : f32
      %77 = vector.broadcast %76 : f32 to vector<1x128xf32>
      %78 = vector.broadcast %cst_19 : f32 to vector<1x128xf32>
      %79 = arith.select %72, %77, %78 : vector<1x128xi1>, vector<1x128xf32>
      %c0_20 = arith.constant 0 : index
      %c0_21 = arith.constant 0 : index
      %80 = vector.load %arg4[%c0_20, %c0_21] : memref<1x128xf32, #tpu.memory_space<vmem>>, vector<1x128xf32>
      tpu.vector_store %arg4[%c0_20, %c0_21], %79 {strides = array<i32>} : memref<1x128xf32, #tpu.memory_space<vmem>>, vector<1x128xf32>,
    } else {
    }
    return
  }
  func.func @transform_0(%arg0: i32) -> (i32, i32) {
    %c0_i32 = arith.constant 0 : i32
    %c0_i32_0 = arith.constant 0 : i32
    return %c0_i32, %arg0 : i32, i32
  }
  func.func @transform_1(%arg0: i32) -> (i32, i32) {
    %c0_i32 = arith.constant 0 : i32
    %c0_i32_0 = arith.constant 0 : i32
    return %c0_i32, %arg0 : i32, i32
  }
  func.func @transform_2(%arg0: i32) -> (i32, i32) {
    %c0_i32 = arith.constant 0 : i32
    %c0_i32_0 = arith.constant 0 : i32
    %c0_i32_1 = arith.constant 0 : i32
    return %c0_i32, %c0_i32_0 : i32, i32
  }
  func.func @transform_3(%arg0: i32) -> (i32, i32) {
    %c0_i32 = arith.constant 0 : i32
    %c0_i32_0 = arith.constant 0 : i32
    return %c0_i32, %arg0 : i32, i32
  }
}

</mosaic_0001>

<bundles_post_ra>
// kernel: tpu_custom_call.1
= control target key start
LH: loop header
LB: loop body
LE: loop exit
PB: predicated region body
PF: predicated region fallthrough
CT: control target
= control target key end

     0   :  { %8 = vsyncpa [#allocation3], 0  ;;  %s312_s0 = inlined_call_operand.hbm [shape: f32[4,16], index: 0, kind: input, shape index: {}]   ;;  %s313_s1 = inlined_call_operand.vmem [shape: s32[1,16], index: 1, kind: input, shape index: {}]   ;;  %s314_s2 = inlined_call_operand.hbm [shape: f32[4,4], index: 2, kind: input, shape index: {}]   ;;  %s315_s3 = inlined_call_operand.hbm [shape: f32[1,128], index: 3, kind: output, shape index: {}]  }
   0x1   :  { %9 = vsyncpa [#allocation6], 0 }
   0x2   :  { %10 = vsyncpa [#allocation4], 0  ;;  %s270_s12 = smov [#allocation2]   ;;  %s271_s14 = smov [#allocation5]  }
   0x3   :  { %s17_s13 = sshll.u32 %s270_s12, 4  ;;  %s29_s15 = sshll.u32 %s271_s14, 4  ;;  %s18_s13 = int_to_ptr.vmem [resolvable:$true] %s17_s13  ;;  %s30_s15 = int_to_ptr.vmem [resolvable:$true] %s29_s15 }
   0x4   :  { %s212_s16 = scalar_lea.vmem %s18_s13, 64  ;;  %p217_p1 = scmp.lt.s32.totalorder %s18_s13, %s18_s13 }
   0x5   :  { %p213_p0 = scmp.ne.s32.totalorder %s18_s13, %s212_s16  ;;  %p218_p2 = scmp.lt.s32.totalorder %s212_s16, %s212_s16 }
   0x7   :  { %p219_p3 = por %p218_p2, %p217_p1 }
   0x9   :  { %p220_p4 = pnand %p219_p3, %p213_p0 }
   0xb   :  { %223 = shalt.err (!%p220_p4)
}
   0xc   :  { %20 = dma.hbm_to_vmem [thread:$0]  %s312_s0, 64, %s18_s13, [#allocation3]  }
   0xd   :  { %s232_s19 = scalar_lea.vmem %s30_s15, 64  ;;  %p237_p6 = scmp.lt.s32.totalorder %s30_s15, %s30_s15 }
   0xe   :  { %p233_p5 = scmp.ne.s32.totalorder %s30_s15, %s232_s19  ;;  %p238_p7 = scmp.lt.s32.totalorder %s232_s19, %s232_s19 }
  0x10   :  { %p239_p8 = por %p238_p7, %p237_p6 }
  0x12   :  { %p240_p9 = pnand %p239_p8, %p233_p5 }
  0x14   :  { %243 = shalt.err (!%p240_p9)
}
  0x15   :  { %32 = dma.hbm_to_vmem [thread:$0]  %s314_s2, 64, %s30_s15, [#allocation6]  }
  0x16   :  { %264 = dma.done.wait [#allocation3], 64  }
  0x17   :  { %265 = vsyncadd [#allocation3], 4294967232 }
  0x18   :  { %266 = dma.done.wait [#allocation6], 64  }
  0x19   :  { %267 = vsyncadd [#allocation6], 4294967232  ;;  %v272_v0 = vmov 0   ;;  %v273_v1 = vmov 2   ;;  %v60_v2 = vld [vmem:[#allocation5] sm:$0xf]  ;;  %v63_v17 = vlaneseq }
  0x1a   :  { %195 = vset.pattern.permute.xlu0 %v272_v0  ;;  %197 = vset.pattern.permute.xlu1 %v273_v1  ;;  %v274_v3 = vmov 1   ;;  %v275_v4 = vmov 3   ;;  %vm40_vm0 = vcmask 1043456   ;;  %v39_v5 = vld [vmem:[#allocation2] sm:$0xf]  ;;  %vm156_vm10 = vcmask 1040384  }
  0x1b   :  { %70 = vperm.xlu0 %195, %v60_v2   ;;  %96 = vperm.xlu1 %197, %v60_v2   ;;  %v41_v6 = vsel %vm40_vm0, %v39_v5, -inf  ;;  %v59_v19 = vld [vmem:[%s313_s1] sm:$0x1]  ;;  %v64_v20 = vshrl.u32 %v63_v17, 7  ;;  %v149_v52 = vand.u32 127, %v63_v17  ;;  %s276_s1 = smov [#allocation7]  }
  0x1c   :  { %v42_v7 = vrot.slane %v41_v6, 4  ;;  %vm61_vm1 = vcmp.eq.s32.totalorder %v59_v19, 0  ;;  %vm75_vm2 = vcmp.eq.s32.totalorder %v59_v19, 1  ;;  %vm88_vm3 = vcmp.eq.s32.totalorder %v59_v19, 2  ;;  %s176_s22 = sshll.u32 %s276_s1, 4  ;;  %s177_s22 = int_to_ptr.vmem [resolvable:$true] %s176_s22 }
  0x1d   :  { %v65_v22 = vsub.s32 0, %v64_v20  ;;  %vm101_vm4 = vcmp.eq.s32.totalorder %v59_v19, 3  ;;  %v62_v23 = vsel %vm61_vm1, 1, %v272_v0  ;;  %v76_v24 = vsel %vm75_vm2, 1, %v272_v0  ;;  %s244_s24 = scalar_lea.vmem %s177_s22, 16  ;;  %s248_s25 = scalar_lea.vmem %s177_s22, 32 }
  0x1e   :  { %v43_v8 = vmax.f32 %v41_v6, %v42_v7  ;;  %v89_v26 = vsel %vm88_vm3, 1, %v272_v0  ;;  %v102_v27 = vsel %vm101_vm4, 1, %v272_v0  ;;  %vm153_vm9 = vcmp.lt.s32.totalorder %v149_v52, 16  ;;  %p245_p10 = scmp.ne.s32.totalorder %s177_s22, %s244_s24  ;;  %p249_p11 = scmp.lt.s32.totalorder %s177_s22, %s177_s22 }
  0x1f   :  { %196 = vset.pattern.permute.xlu0 %v274_v3  ;;  %198 = vset.pattern.permute.xlu1 %v275_v4  ;;  %v66_v28 = vrot.slane %v62_v23, %v65_v22  ;;  %v80_v29 = vrot.slane %v76_v24, %v65_v22  ;;  %v93_v33 = vrot.slane %v89_v26, %v65_v22  ;;  %vm155_vm11 = vcmp.eq.s32.totalorder %v149_v52, 0  ;;  %p250_p12 = scmp.lt.s32.totalorder %s248_s25, %s244_s24 }
  0x20   :  { %83 = vperm.xlu0 %196, %v60_v2   ;;  %109 = vperm.xlu1 %198, %v60_v2   ;;  %v44_v9 = vrot.slane %v43_v8, 2  ;;  %v106_v34 = vrot.slane %v102_v27, %v65_v22 }
  0x21   :  { %vm67_vm5 = vcmp.eq.s32.totalorder %v66_v28, 1  ;;  %vm81_vm6 = vcmp.eq.s32.totalorder %v80_v29, 1  ;;  %vm94_vm7 = vcmp.eq.s32.totalorder %v93_v33, 1  ;;  %p251_p13 = por %p250_p12, %p249_p11 }
  0x22   :  { %v45_v10 = vmax.f32 %v43_v8, %v44_v9  ;;  %vm107_vm8 = vcmp.eq.s32.totalorder %v106_v34, 1 }
  0x23   :  { %p252_p0 = pnand %p251_p13, %p245_p10 }
  0x24   :  { %199 = vset.pattern.permute.xlu0 %v275_v4  ;;  %v46_v11 = vrot.slane %v45_v10, 1 }
  0x26   :  { %v47_v12 = vmax.f32 %v45_v10, %v46_v11 }
  0x28   :  { %v48_v13 = vsub.f32 %v39_v5, %v47_v12 }
  0x2a   :  { %v49_v14 = vmul.f32 1.442695, %v48_v13 }
  0x2c   :  { %200 = vpow2.f32 %v49_v14 }
  0x39   :  { %v201_v15 = vpop.eup %200 }
  0x3a   :  { %v51_v16 = vsel %vm40_vm0, %v201_v15, 0.0 }
  0x3b   :  { %v52_v18 = vrot.slane %v51_v16, 4 }
  0x3d   :  { %v53_v21 = vadd.f32 %v52_v18, %v51_v16 }
  0x3f   :  { %v54_v25 = vrot.slane %v53_v21, 2 }
  0x41   :  { %v55_v32 = vadd.f32 %v54_v25, %v53_v21 }
  0x43   :  { %v56_v35 = vrot.slane %v55_v32, 1 }
  0x45   :  { %v57_v42 = vadd.f32 %v56_v35, %v55_v32 }
  0x47   :  { %202 = vrcp.f32 %v57_v42 }
  0x54   :  { %v203_v54 = vpop.eup %202 }
  0x96   :  { %v71_v30 = vpop.permute.xlu0 %70  ;;  %v97_v31 = vpop.permute.xlu1 %96 }
  0x97   :  { %v73_v38 = vsel %vm67_vm5, %v71_v30, 0.0  ;;  %v99_v41 = vsel %vm94_vm7, %v97_v31, 0.0 }
  0x9b   :  { %v84_v36 = vpop.permute.xlu0 %83  ;;  %v110_v37 = vpop.permute.xlu1 %109 }
  0x9c   :  { %v86_v39 = vsel %vm81_vm6, %v84_v36, 0.0  ;;  %v112_v43 = vsel %vm107_vm8, %v110_v37, 0.0 }
  0x9d   :  { %v87_v40 = vadd.f32 %v86_v39, %v73_v38 }
  0x9f   :  { %v100_v44 = vadd.f32 %v99_v41, %v87_v40 }
  0xa1   :  { %v113_v45 = vadd.f32 %v112_v43, %v100_v44 }
  0xa3   :  { %v114_v46 = vmul.f32 %v201_v15, %v113_v45 }
  0xa5   :  { %v115_v47 = vsel %vm40_vm0, %v114_v46, 0.0 }
  0xa6   :  { %v116_v48 = vrot.slane %v115_v47, 4 }
  0xa8   :  { %v117_v49 = vadd.f32 %v116_v48, %v115_v47 }
  0xaa   :  { %v118_v50 = vrot.slane %v117_v49, 2 }
  0xac   :  { %v119_v51 = vadd.f32 %v118_v50, %v117_v49 }
  0xae   :  { %v120_v53 = vrot.slane %v119_v51, 1 }
  0xb0   :  { %v121_v55 = vadd.f32 %v120_v53, %v119_v51 }
  0xb2   :  { %v122_v56 = vmul.f32 %v203_v54, %v121_v55 }
  0xb4   :  { %v154_v57 = vsel %vm153_vm9, %v122_v56, 0.0 }
  0xb5   :  { %v157_v58 = vsel %vm156_vm10, %v154_v57, 0.0 }
  0xb6   :  { %158 = vadd.xlane.f32.xlu1 %v157_v58 }
 0x13f   :  { %v159_v59 = vpop.xlane.xlu1 %158 }
 0x140   :  { %v160_v60 = vrot.slane %v159_v59, 4 }
 0x142   :  { %v161_v61 = vadd.f32 %v160_v60, %v159_v59 }
 0x144   :  { %v162_v62 = vrot.slane %v161_v61, 2 }
 0x146   :  { %v163_v63 = vadd.f32 %v162_v62, %v161_v61 }
 0x148   :  { %v164_v0 = vrot.slane %v163_v63, 1 }
 0x14a   :  { %v165_v1 = vadd.f32 %v164_v0, %v163_v63 }
 0x14c   :  { %186 = vpush %v165_v1 }
 0x17d   :  { %s187_s23 = spop %186 }
 0x17e   :  { %v167_v2 = vstv %s187_s23 }
 0x17f   :  { %v168_v3 = vsel %vm155_vm11, %v167_v2, 0.0 }
 0x180   :  { %169 = vst [vmem:[#allocation7] sm:$0x1] %v168_v3 }
 0x181   :  { %255 = shalt.err (!%p252_p0)
}
 0x182   :  { %179 = dma.vmem_to_hbm [thread:$0]  %s177_s22, 16, %s315_s3, [#allocation4]  }
 0x183   :  { %268 = dma.done.wait [#allocation4], 16  }
 0x184   :  { %269 = vsyncadd [#allocation4], 4294967280 }
 0x185   :  { %183 = vsyncpa [#allocation3], 1 }
 0x186   :  { %184 = vsyncpa [#allocation6], 1 }
 0x187   :  { %185 = vsyncpa [#allocation4], 1 }

</bundles_post_ra>
